<compile_context>
chip_gen: v5e
topology: v5e:2x2
jax: 0.10.0
libtpu: 0.0.40
codegen_flags: <defaults>
</compile_context>

<pallas_src>
import jax
import jax.numpy as jnp
from jax.experimental import pallas as pl
from jax.experimental.pallas import tpu as pltpu


_LANE_CHOICES = (1024, 512, 256, 128)


def _elementwise_kernel(x_ref, add_ref, sub_ref, mul_ref, div_ref, gt_ref, lt_ref):
    x = x_ref[...]
    add_ref[...] = x + 2.0
    sub_ref[...] = x - 2.0
    mul_ref[...] = x * 3.0
    div_ref[...] = x * 0.25  # x / 4 (exact: power-of-two divisor)
    gt_ref[...] = (x > 1.0).astype(gt_ref.dtype)
    lt_ref[...] = (x < 5.0).astype(lt_ref.dtype)


def _chip_config():
    """(max_block_elems, is_v7x, vmem_limit_bytes) for the current TPU generation."""
    kind = ""
    try:
        kind = jax.devices()[0].device_kind.lower()
    except Exception:
        pass
    if "v7" in kind or "tpu7" in kind or "7x" in kind:
        # 2 TCs, 64 MiB physical VMEM: ~11 MiB/step (~22 MiB double-buffered).
        return 512 * 1024, True, 40 * 1024 * 1024
    if "v6" in kind:
        # 128 MiB physical VMEM: ~11 MiB/step is comfortably within budget.
        return 512 * 1024, False, 40 * 1024 * 1024
    # v5e / unknown: stay under the 16 MiB default scoped-VMEM limit
    # (~11 MiB double-buffered at 256K elems/step).
    return 256 * 1024, False, None


_BOOL_OUT_OK = None


def _bool_outputs_supported():
    """Probe once whether Mosaic lowers jnp.bool_ kernel outputs on this backend."""
    global _BOOL_OUT_OK
    if _BOOL_OUT_OK is None:
        def _probe(x_ref, o_ref):
            o_ref[...] = x_ref[...] > 0.0

        try:
            out = pl.pallas_call(
                _probe,
                out_shape=jax.ShapeDtypeStruct((8, 128), jnp.bool_),
            )(jnp.ones((8, 128), jnp.float32))
            jax.block_until_ready(out)
            _BOOL_OUT_OK = bool(out[0, 0])
        except Exception:
            # TODO(synk): drop the int8 fallback once Mosaic i1 stores lower everywhere.
            _BOOL_OUT_OK = False
    return _BOOL_OUT_OK


def pt_module_forward(x):
    """Replicates PtModule.forward for a float input of arbitrary shape."""
    orig_shape = x.shape
    n = x.size

    if n == 0:  # guard: empty input would otherwise produce a zero-size grid
        z = jnp.zeros(orig_shape, x.dtype)
        zb = jnp.zeros(orig_shape, jnp.bool_)
        return (z, z, z, z, zb, zb)

    bool_dtype = jnp.bool_ if _bool_outputs_supported() else jnp.int8

    # Lane-dense slab width: prefer one that divides n exactly (no pad, free reshapes).
    lanes = None
    for cand in _LANE_CHOICES:
        if n % cand == 0:
            lanes = cand
            break
    padded_path = lanes is None
    if padded_path:
        lanes = 128

    rows = pl.cdiv(n, lanes)

    max_block_elems, is_v7x, vmem_limit = _chip_config()
    max_rows = max_block_elems // lanes  # power of two >= 256 -> multiple of 32
    if rows <= max_rows:
        tm = rows  # single full-extent block: exempt from the (32,128) tiling rule
    else:
        tm = max_rows

    xf = x.reshape(-1)
    if padded_path:
        xf = jnp.pad(xf, (0, rows * lanes - n))
    x2d = xf.reshape(rows, lanes)

    grid = (pl.cdiv(rows, tm),)  # ragged last block: Pallas masks the tail stores
    spec = pl.BlockSpec((tm, lanes), lambda i: (i, 0))

    out_shape = (
        jax.ShapeDtypeStruct((rows, lanes), x.dtype),     # added
        jax.ShapeDtypeStruct((rows, lanes), x.dtype),     # subtracted
        jax.ShapeDtypeStruct((rows, lanes), x.dtype),     # multiplied
        jax.ShapeDtypeStruct((rows, lanes), x.dtype),     # divided
        jax.ShapeDtypeStruct((rows, lanes), bool_dtype),  # greater_than
        jax.ShapeDtypeStruct((rows, lanes), bool_dtype),  # less_than
    )

    if is_v7x and grid[0] >= 2:
        dim_sem = (pltpu.CORE_PARALLEL,)  # shard the row grid across both v7x TCs
    else:
        dim_sem = ("parallel",)

    cp_kwargs = dict(dimension_semantics=dim_sem)
    if vmem_limit is not None:
        cp_kwargs["vmem_limit_bytes"] = vmem_limit
    if padded_path:
        # Let XLA fuse the pad into the pallas_call input instead of materializing
        # a padded HBM copy in front of the kernel.
        cp_kwargs["allow_input_fusion"] = [True]

    outs = pl.pallas_call(
        _elementwise_kernel,
        out_shape=out_shape,
        grid=grid,
        in_specs=[spec],
        out_specs=tuple([spec] * 6),
        compiler_params=pltpu.CompilerParams(**cp_kwargs),
    )(x2d)

    def unflatten(a):
        flat = a.reshape(-1)
        if flat.shape[0] != n:  # only in the padded fallback path
            flat = flat[:n]
        return flat.reshape(orig_shape)

    added, subtracted, multiplied, divided, gt, lt = outs
    gt = unflatten(gt)
    lt = unflatten(lt)
    if bool_dtype is not jnp.bool_:
        gt = gt.astype(jnp.bool_)
        lt = lt.astype(jnp.bool_)
    return (
        unflatten(added),
        unflatten(subtracted),
        unflatten(multiplied),
        unflatten(divided),
        gt,
        lt,
    )


if __name__ == "__main__":
    key = jax.random.PRNGKey(0)
    x = jax.random.normal(key, (2, 4, 16, 16), dtype=jnp.float32) * 3.0

    fwd = jax.jit(pt_module_forward)
    outs = jax.block_until_ready(fwd(x))

    # Reference check against plain jnp (exact-divide / no-padding path).
    ref = (x + 2, x - 2, x * 3, x / 4, x > 1, x < 5)
    for got, exp in zip(outs, ref):
        assert got.dtype == exp.dtype, (got.dtype, exp.dtype)
        assert got.shape == exp.shape, (got.shape, exp.shape)
        if got.dtype == jnp.bool_:
            assert bool(jnp.all(got == exp))
        else:
            assert bool(jnp.allclose(got, exp, atol=1e-6))

    # Exercise the padded fallback path (size not a multiple of 128).
    x2 = jax.random.normal(jax.random.PRNGKey(1), (3, 5, 7), dtype=jnp.float32) * 4.0
    outs2 = jax.block_until_ready(jax.jit(pt_module_forward)(x2))
    ref2 = (x2 + 2, x2 - 2, x2 * 3, x2 / 4, x2 > 1, x2 < 5)
    for got, exp in zip(outs2, ref2):
        assert got.dtype == exp.dtype, (got.dtype, exp.dtype)
        assert got.shape == exp.shape, (got.shape, exp.shape)
        if got.dtype == jnp.bool_:
            assert bool(jnp.all(got == exp))
        else:
            assert bool(jnp.allclose(got, exp, atol=1e-6))

    print("KERNEL_OK")
</pallas_src>

<mosaic_0001>
module attributes {stable_mosaic.version = 11 : i64} {
  func.func @_elementwise_kernel(%arg0: i32, %arg1: memref<2x1024xf32, #tpu.memory_space<vmem>>, %arg2: memref<2x1024xf32, #tpu.memory_space<vmem>>, %arg3: memref<2x1024xf32, #tpu.memory_space<vmem>>, %arg4: memref<2x1024xf32, #tpu.memory_space<vmem>>, %arg5: memref<2x1024xf32, #tpu.memory_space<vmem>>, %arg6: memref<2x1024xi8, #tpu.memory_space<vmem>>, %arg7: memref<2x1024xi8, #tpu.memory_space<vmem>>) attributes {dimension_semantics = [#tpu.dimension_semantics<parallel>], iteration_bounds = array<i64: 1>, scalar_prefetch = 0 : i64, scratch_operands = 0 : i64, tpu.core_type = #tpu.core_type<tc>, window_params = [{transform_indices = @transform_0, window_bounds = array<i64: 2, 1024>}, {transform_indices = @transform_1, window_bounds = array<i64: 2, 1024>}, {transform_indices = @transform_2, window_bounds = array<i64: 2, 1024>}, {transform_indices = @transform_3, window_bounds = array<i64: 2, 1024>}, {transform_indices = @transform_4, window_bounds = array<i64: 2, 1024>}, {transform_indices = @transform_5, window_bounds = array<i64: 2, 1024>}, {transform_indices = @transform_6, window_bounds = array<i64: 2, 1024>}]} {
    %c0 = arith.constant 0 : index
    %c0_0 = arith.constant 0 : index
    %0 = vector.load %arg1[%c0, %c0_0] : memref<2x1024xf32, #tpu.memory_space<vmem>>, vector<2x1024xf32>
    %cst = arith.constant 2.000000e+00 : f32
    %1 = vector.broadcast %cst : f32 to vector<2x1024xf32>
    %2 = arith.addf %0, %1 : vector<2x1024xf32>
    %c0_1 = arith.constant 0 : index
    %c0_2 = arith.constant 0 : index
    %3 = vector.load %arg2[%c0_1, %c0_2] : memref<2x1024xf32, #tpu.memory_space<vmem>>, vector<2x1024xf32>
    tpu.vector_store %arg2[%c0_1, %c0_2], %2 {strides = array<i32>} : memref<2x1024xf32, #tpu.memory_space<vmem>>, vector<2x1024xf32>,
    %cst_3 = arith.constant 2.000000e+00 : f32
    %4 = vector.broadcast %cst_3 : f32 to vector<2x1024xf32>
    %5 = arith.subf %0, %4 : vector<2x1024xf32>
    %c0_4 = arith.constant 0 : index
    %c0_5 = arith.constant 0 : index
    %6 = vector.load %arg3[%c0_4, %c0_5] : memref<2x1024xf32, #tpu.memory_space<vmem>>, vector<2x1024xf32>
    tpu.vector_store %arg3[%c0_4, %c0_5], %5 {strides = array<i32>} : memref<2x1024xf32, #tpu.memory_space<vmem>>, vector<2x1024xf32>,
    %cst_6 = arith.constant 3.000000e+00 : f32
    %7 = vector.broadcast %cst_6 : f32 to vector<2x1024xf32>
    %8 = arith.mulf %0, %7 : vector<2x1024xf32>
    %c0_7 = arith.constant 0 : index
    %c0_8 = arith.constant 0 : index
    %9 = vector.load %arg4[%c0_7, %c0_8] : memref<2x1024xf32, #tpu.memory_space<vmem>>, vector<2x1024xf32>
    tpu.vector_store %arg4[%c0_7, %c0_8], %8 {strides = array<i32>} : memref<2x1024xf32, #tpu.memory_space<vmem>>, vector<2x1024xf32>,
    %cst_9 = arith.constant 2.500000e-01 : f32
    %10 = vector.broadcast %cst_9 : f32 to vector<2x1024xf32>
    %11 = arith.mulf %0, %10 : vector<2x1024xf32>
    %c0_10 = arith.constant 0 : index
    %c0_11 = arith.constant 0 : index
    %12 = vector.load %arg5[%c0_10, %c0_11] : memref<2x1024xf32, #tpu.memory_space<vmem>>, vector<2x1024xf32>
    tpu.vector_store %arg5[%c0_10, %c0_11], %11 {strides = array<i32>} : memref<2x1024xf32, #tpu.memory_space<vmem>>, vector<2x1024xf32>,
    %cst_12 = arith.constant 1.000000e+00 : f32
    %13 = vector.broadcast %cst_12 : f32 to vector<2x1024xf32>
    %14 = arith.cmpf ogt, %0, %13 : vector<2x1024xf32>
    %15 = arith.extui %14 : vector<2x1024xi1> to vector<2x1024xi8>
    %c0_13 = arith.constant 0 : index
    %c0_14 = arith.constant 0 : index
    %16 = vector.load %arg6[%c0_13, %c0_14] : memref<2x1024xi8, #tpu.memory_space<vmem>>, vector<2x1024xi8>
    tpu.vector_store %arg6[%c0_13, %c0_14], %15 {strides = array<i32>} : memref<2x1024xi8, #tpu.memory_space<vmem>>, vector<2x1024xi8>,
    %cst_15 = arith.constant 5.000000e+00 : f32
    %17 = vector.broadcast %cst_15 : f32 to vector<2x1024xf32>
    %18 = arith.cmpf olt, %0, %17 : vector<2x1024xf32>
    %19 = arith.extui %18 : vector<2x1024xi1> to vector<2x1024xi8>
    %c0_16 = arith.constant 0 : index
    %c0_17 = arith.constant 0 : index
    %20 = vector.load %arg7[%c0_16, %c0_17] : memref<2x1024xi8, #tpu.memory_space<vmem>>, vector<2x1024xi8>
    tpu.vector_store %arg7[%c0_16, %c0_17], %19 {strides = array<i32>} : memref<2x1024xi8, #tpu.memory_space<vmem>>, vector<2x1024xi8>,
    return
  }
  func.func @transform_0(%arg0: i32) -> (i32, i32) {
    %c0_i32 = arith.constant 0 : i32
    %c0_i32_0 = arith.constant 0 : i32
    return %arg0, %c0_i32 : i32, i32
  }
  func.func @transform_1(%arg0: i32) -> (i32, i32) {
    %c0_i32 = arith.constant 0 : i32
    %c0_i32_0 = arith.constant 0 : i32
    return %arg0, %c0_i32 : i32, i32
  }
  func.func @transform_2(%arg0: i32) -> (i32, i32) {
    %c0_i32 = arith.constant 0 : i32
    %c0_i32_0 = arith.constant 0 : i32
    return %arg0, %c0_i32 : i32, i32
  }
  func.func @transform_3(%arg0: i32) -> (i32, i32) {
    %c0_i32 = arith.constant 0 : i32
    %c0_i32_0 = arith.constant 0 : i32
    return %arg0, %c0_i32 : i32, i32
  }
  func.func @transform_4(%arg0: i32) -> (i32, i32) {
    %c0_i32 = arith.constant 0 : i32
    %c0_i32_0 = arith.constant 0 : i32
    return %arg0, %c0_i32 : i32, i32
  }
  func.func @transform_5(%arg0: i32) -> (i32, i32) {
    %c0_i32 = arith.constant 0 : i32
    %c0_i32_0 = arith.constant 0 : i32
    return %arg0, %c0_i32 : i32, i32
  }
  func.func @transform_6(%arg0: i32) -> (i32, i32) {
    %c0_i32 = arith.constant 0 : i32
    %c0_i32_0 = arith.constant 0 : i32
    return %arg0, %c0_i32 : i32, i32
  }
}

</mosaic_0001>

<bundles_post_ra>
// kernel: pt_module_forward.1
= control target key start
LH: loop header
LB: loop body
LE: loop exit
PB: predicated region body
PF: predicated region fallthrough
CT: control target
= control target key end

     0   :  { %v267_v2 = vmov 0   ;;  %vm496_vm2 = vcmask 1040384   ;;  %vm123_vm3 = vsmask.f32 256  ;;  %vm125_vm4 = vcmask 1041409   ;;  %s487_s0 = inlined_call_operand.vmem [shape: f32[2,1024], index: 0, kind: input, shape index: {}]   ;;  %s488_s1 = inlined_call_operand.vmem [shape: f32[2,1024], index: 1, kind: output, shape index: {0}]   ;;  %s489_s2 = inlined_call_operand.vmem [shape: f32[2,1024], index: 2, kind: output, shape index: {1}]   ;;  %s490_s3 = inlined_call_operand.vmem [shape: f32[2,1024], index: 3, kind: output, shape index: {2}]   ;;  %s491_s4 = inlined_call_operand.vmem [shape: f32[2,1024], index: 4, kind: output, shape index: {3}]   ;;  %s492_s5 = inlined_call_operand.vmem [shape: s8[2,1024], index: 5, kind: output, shape index: {4}]   ;;  %s493_s6 = inlined_call_operand.vmem [shape: s8[2,1024], index: 6, kind: output, shape index: {5}]  }
   0x1   :  { %v306_v0 = vld [vmem:[%s487_s0] sm:$0xff]  ;;  %v311_v1 = vld [vmem:[%s487_s0 + $0x8] sm:$0xff]  ;;  %vm126_vm5 = vsmask.f32 1280  ;;  %vm318_vm6 = vmand %vm496_vm2, %vm123_vm3  ;;  %vm495_vm8 = vcmask 1042434   ;;  %vm133_vm10 = vcmask 1043459  }
   0x2   :  { %vm34_vm0 = vcmp.gt.f32.partialorder %v306_v0, 1.0  ;;  %vm35_vm1 = vcmp.gt.f32.partialorder %v311_v1, 1.0  ;;  %vm322_vm7 = vmand %vm125_vm4, %vm126_vm5  ;;  %vm130_vm9 = vsmask.f32 2304  ;;  %vm134_vm11 = vsmask.f32 3328 }
   0x3   :  { %v36_v3 = vsel %vm34_vm0, 1, %v267_v2  ;;  %v37_v4 = vsel %vm35_vm1, 1, %v267_v2  ;;  %vm128_vm12 = vmor %vm322_vm7, %vm318_vm6  ;;  %v18_v18 = vadd.f32 2.0, %v306_v0  ;;  %v19_v19 = vadd.f32 2.0, %v311_v1 }
   0x4   :  { %38 = vst [vmem:[#allocation1] ss:$2 sm:$0xff] %v36_v3  ;;  %vm131_vm13 = vmand %vm495_vm8, %vm130_vm9  ;;  %v264_v21 = vadd.f32 -2.0, %v306_v0  ;;  %v265_v22 = vadd.f32 -2.0, %v311_v1  ;;  %vm494_vm5 = vcmask 1044484   ;;  %v26_v24 = vmul.f32 3.0, %v306_v0 }
   0x5   :  { %40 = vst [vmem:[#allocation1 + $0x10] ss:$2 sm:$0xff] %v37_v4  ;;  %vm340_vm3 = vmor %vm131_vm13, %vm128_vm12  ;;  %vm138_vm6 = vsmask.f32 4352  ;;  %v27_v25 = vmul.f32 3.0, %v311_v1  ;;  %v30_v27 = vmul.f32 0.25, %v306_v0 }
   0x6   :  { %vm348_vm4 = vmand %vm133_vm10, %vm134_vm11  ;;  %20 = vst [vmem:[%s488_s1] sm:$0xff] %v18_v18  ;;  %vm141_vm11 = vcmask 1045509   ;;  %vm142_vm12 = vsmask.f32 5376  ;;  %v31_v28 = vmul.f32 0.25, %v311_v1  ;;  %vm156_vm13 = vcmp.lt.f32.partialorder %v306_v0, 5.0  ;;  %v153_v3 = vld [vmem:[%s492_s5] sm:$0xff] }
   0x7   :  { %21 = vst [vmem:[%s488_s1 + $0x8] sm:$0xff] %v19_v19  ;;  %vm136_vm9 = vmor %vm348_vm4, %vm340_vm3  ;;  %v158_v31 = vsel %vm156_vm13, 1, %v267_v2  ;;  %vm146_vm4 = vsmask.f32 6400 }
   0x8   :  { %24 = vst [vmem:[%s489_s2] sm:$0xff] %v264_v21  ;;  %vm139_vm10 = vmand %vm494_vm5, %vm138_vm6 }
   0x9   :  { %25 = vst [vmem:[%s489_s2 + $0x8] sm:$0xff] %v265_v22 }
   0xa   :  { %28 = vst [vmem:[%s490_s3] sm:$0xff] %v26_v24 }
   0xb   :  { %v41_v7 = vld.sshfl [vmem:[#allocation1] sm:$0xff pattern:$0x75643120]  ;;  %v42_v8 = vld.sshfl [vmem:[#allocation1 + $0x8] sm:$0xff pattern:$0x75643120]  ;;  %32 = vst [vmem:[%s491_s4] sm:$0xff] %v30_v27 }
   0xc   :  { %v43_v9 = vld.sshfl [vmem:[#allocation1 + $0x10] sm:$0xff pattern:$0x75643120]  ;;  %v44_v10 = vld.sshfl [vmem:[#allocation1 + $0x18] sm:$0xff pattern:$0x75643120] }
   0xd   :  { %vm45_vm14 = vcmp.ne.s32.totalorder %v41_v7, 0  ;;  %vm46_vm15 = vcmp.ne.s32.totalorder %v42_v8, 0  ;;  %vm47_vm0 = vcmp.ne.s32.totalorder %v43_v9, 0  ;;  %vm48_vm1 = vcmp.ne.s32.totalorder %v44_v10, 0  ;;  %29 = vst [vmem:[%s490_s3 + $0x8] sm:$0xff] %v27_v25 }
   0xe   :  { %v49_v11 = vsel %vm45_vm14, 1, %v267_v2  ;;  %v50_v12 = vsel %vm46_vm15, 1, %v267_v2  ;;  %v51_v13 = vsel %vm47_vm0, 1, %v267_v2  ;;  %v52_v14 = vsel %vm48_vm1, 1, %v267_v2  ;;  %vm385_vm14 = vmor %vm139_vm10, %vm136_vm9  ;;  %33 = vst [vmem:[%s491_s4 + $0x8] sm:$0xff] %v31_v28 }
   0xf   :  { %v53_v15 = vpack.c.b16 %v50_v12, %v49_v11  ;;  %v54_v16 = vpack.c.b16 %v52_v14, %v51_v13  ;;  %vm157_vm15 = vcmp.lt.f32.partialorder %v311_v1, 5.0  ;;  %vm393_vm0 = vmand %vm141_vm11, %vm142_vm12  ;;  %vm113_vm1 = vcmask 1046534  }
  0x10   :  { %v159_v32 = vsel %vm157_vm15, 1, %v267_v2  ;;  %vm144_vm3 = vmor %vm393_vm0, %vm385_vm14  ;;  %vm149_vm12 = vcmask 1047559   ;;  %vm514_vm14 = vcmask 1042434   ;;  %vm515_vm0 = vcmask 1044484  }
  0x11   :  { %v55_v23 = vpack.c.b8 %v54_v16, %v53_v15  ;;  %vm147_vm6 = vmand %vm113_vm1, %vm146_vm4 }
  0x12   :  { %vm424_vm4 = vmor %vm147_vm6, %vm144_vm3 }
  0x13   :  { %vm56_vm7 = vnez %v55_v23 }
  0x14   :  { %v57_v26 = vsel %vm56_vm7, 16843009, %v267_v2  ;;  %vm150_vm7 = vsmask.f32 7424 }
  0x15   :  { %59 = vst [vmem:[#allocation1] ss:$9 sm:$0xff] %v57_v26 }
  0x1c   :  { %v60_v33 = vld [vmem:[#allocation1] sm:$0xff]  ;;  %v62_v34 = vld [vmem:[#allocation1 + $0x9] sm:$0xff]  ;;  %v64_v35 = vld [vmem:[#allocation1 + $0x12] sm:$0xff] }
  0x1d   :  { %160 = vst [vmem:[#allocation1] ss:$2 sm:$0xff] %v158_v31  ;;  %v66_v36 = vld [vmem:[#allocation1 + $0x1b] sm:$0xff]  ;;  %v68_v37 = vld [vmem:[#allocation1 + $0x24] sm:$0xff]  ;;  %v70_v38 = vld [vmem:[#allocation1 + $0x2d] sm:$0xff]  ;;  %vm76_vm9 = vnez %v60_v33  ;;  %vm77_vm10 = vnez %v62_v34  ;;  %vm78_vm11 = vnez %v64_v35 }
  0x1e   :  { %162 = vst [vmem:[#allocation1 + $0x10] ss:$2 sm:$0xff] %v159_v32  ;;  %v72_v39 = vld [vmem:[#allocation1 + $0x36] sm:$0xff]  ;;  %v74_v40 = vld [vmem:[#allocation1 + $0x3f] sm:$0xff]  ;;  %vm79_vm13 = vnez %v66_v36  ;;  %vm80_vm15 = vnez %v68_v37  ;;  %vm81_vm5 = vnez %v70_v38  ;;  %v84_v41 = vsel %vm76_vm9, 16843009, %v267_v2 }
  0x1f   :  { %vm82_vm8 = vnez %v72_v39  ;;  %vm83_vm2 = vnez %v74_v40  ;;  %v85_v42 = vsel %vm77_vm10, 16843009, %v267_v2  ;;  %v86_v43 = vsel %vm78_vm11, 16843009, %v267_v2 }
  0x20   :  { %v87_v44 = vsel %vm79_vm13, 16843009, %v267_v2  ;;  %v88_v45 = vsel %vm80_vm15, 16843009, %v267_v2  ;;  %v89_v46 = vsel %vm81_vm5, 16843009, %v267_v2 }
  0x21   :  { %v90_v47 = vsel %vm82_vm8, 16843009, %v267_v2  ;;  %v91_v48 = vsel %vm83_vm2, 16843009, %v267_v2  ;;  %v92_v49 = vrot.slane %v85_v42, 7  ;;  %v93_v50 = vrot.slane %v86_v43, 6  ;;  %vm430_vm8 = vmand %vm149_vm12, %vm150_vm7 }
  0x22   :  { %v94_v52 = vrot.slane %v87_v44, 5  ;;  %v95_v53 = vrot.slane %v88_v45, 4  ;;  %v96_v54 = vrot.slane %v89_v46, 3  ;;  %v97_v55 = vrot.slane %v90_v47, 2  ;;  %vm152_vm7 = vmor %vm430_vm8, %vm424_vm4 }
  0x23   :  { %v98_v57 = vrot.slane %v91_v48, 1  ;;  %vm513_vm2 = vcmask 1040384   ;;  %vm117_vm5 = vcmask 1045508   ;;  %vm119_vm9 = vcmask 1043456  }
  0x24   :  { %v102_v58 = vsel %vm513_vm2, %v84_v41, %v92_v49  ;;  %v163_v59 = vld.sshfl [vmem:[#allocation1] sm:$0xff pattern:$0x75643120]  ;;  %v164_v60 = vld.sshfl [vmem:[#allocation1 + $0x8] sm:$0xff pattern:$0x75643120]  ;;  %v106_v61 = vsel %vm514_vm14, %v93_v50, %v94_v52  ;;  %v112_v62 = vsel %vm515_vm0, %v95_v53, %v96_v54 }
  0x25   :  { %vm167_vm3 = vcmp.ne.s32.totalorder %v163_v59, 0  ;;  %vm168_vm6 = vcmp.ne.s32.totalorder %v164_v60, 0  ;;  %v165_v63 = vld.sshfl [vmem:[#allocation1 + $0x10] sm:$0xff pattern:$0x75643120]  ;;  %vm516_vm10 = vcmask 1041408   ;;  %v116_v1 = vsel %vm113_vm1, %v97_v55, %v98_v57 }
  0x26   :  { %v108_v0 = vsel %vm516_vm10, %v102_v58, %v106_v61  ;;  %v171_v4 = vsel %vm167_vm3, 1, %v267_v2  ;;  %v172_v5 = vsel %vm168_vm6, 1, %v267_v2  ;;  %v166_v6 = vld.sshfl [vmem:[#allocation1 + $0x18] sm:$0xff pattern:$0x75643120]  ;;  %vm169_vm11 = vcmp.ne.s32.totalorder %v165_v63, 0 }
  0x27   :  { %v118_v7 = vsel %vm117_vm5, %v112_v62, %v116_v1  ;;  %v175_v8 = vpack.c.b16 %v172_v5, %v171_v4  ;;  %vm170_vm12 = vcmp.ne.s32.totalorder %v166_v6, 0  ;;  %v173_v9 = vsel %vm169_vm11, 1, %v267_v2 }
  0x28   :  { %v120_v10 = vsel %vm119_vm9, %v108_v0, %v118_v7  ;;  %v174_v11 = vsel %vm170_vm12, 1, %v267_v2  ;;  %vm517_vm12 = vcmask 1040384  }
  0x29   :  { %v154_v12 = vsel %vm152_vm7, %v120_v10, %v153_v3  ;;  %v176_v13 = vpack.c.b16 %v174_v11, %v173_v9 }
  0x2a   :  { %155 = vst [vmem:[%s492_s5] sm:$0xff] %v154_v12 }
  0x2b   :  { %v177_v14 = vpack.c.b8 %v176_v13, %v175_v8 }
  0x2d   :  { %vm178_vm13 = vnez %v177_v14 }
  0x2e   :  { %v179_v15 = vsel %vm178_vm13, 16843009, %v267_v2  ;;  %vm518_vm13 = vcmask 1042434  }
  0x2f   :  { %181 = vst [vmem:[#allocation1] ss:$9 sm:$0xff] %v179_v15 }
  0x36   :  { %v182_v16 = vld [vmem:[#allocation1] sm:$0xff]  ;;  %v184_v17 = vld [vmem:[#allocation1 + $0x9] sm:$0xff]  ;;  %v186_v18 = vld [vmem:[#allocation1 + $0x12] sm:$0xff] }
  0x37   :  { %v188_v19 = vld [vmem:[#allocation1 + $0x1b] sm:$0xff]  ;;  %v190_v20 = vld [vmem:[#allocation1 + $0x24] sm:$0xff]  ;;  %v192_v21 = vld [vmem:[#allocation1 + $0x2d] sm:$0xff]  ;;  %vm198_vm15 = vnez %v182_v16  ;;  %vm199_vm2 = vnez %v184_v17  ;;  %vm200_vm14 = vnez %v186_v18 }
  0x38   :  { %v194_v22 = vld [vmem:[#allocation1 + $0x36] sm:$0xff]  ;;  %v196_v23 = vld [vmem:[#allocation1 + $0x3f] sm:$0xff]  ;;  %vm201_vm0 = vnez %v188_v19  ;;  %vm202_vm3 = vnez %v190_v20  ;;  %vm203_vm6 = vnez %v192_v21  ;;  %v206_v24 = vsel %vm198_vm15, 16843009, %v267_v2 }
  0x39   :  { %vm204_vm10 = vnez %v194_v22  ;;  %vm205_vm11 = vnez %v196_v23  ;;  %v207_v25 = vsel %vm199_vm2, 16843009, %v267_v2  ;;  %v208_v26 = vsel %vm200_vm14, 16843009, %v267_v2 }
  0x3a   :  { %v209_v27 = vsel %vm201_vm0, 16843009, %v267_v2  ;;  %v210_v28 = vsel %vm202_vm3, 16843009, %v267_v2  ;;  %v211_v29 = vsel %vm203_vm6, 16843009, %v267_v2 }
  0x3b   :  { %v212_v30 = vsel %vm204_vm10, 16843009, %v267_v2  ;;  %v213_v31 = vsel %vm205_vm11, 16843009, %v267_v2  ;;  %v214_v32 = vrot.slane %v207_v25, 7  ;;  %v215_v33 = vrot.slane %v208_v26, 6 }
  0x3c   :  { %v216_v34 = vrot.slane %v209_v27, 5  ;;  %v217_v35 = vrot.slane %v210_v28, 4  ;;  %v218_v36 = vrot.slane %v211_v29, 3  ;;  %v219_v37 = vrot.slane %v212_v30, 2  ;;  %v237_v2 = vld [vmem:[%s493_s6] sm:$0xff] }
  0x3d   :  { %v220_v38 = vrot.slane %v213_v31, 1  ;;  %v223_v39 = vsel %vm517_vm12, %v206_v24, %v214_v32  ;;  %vm519_vm15 = vcmask 1044484   ;;  %vm520_vm2 = vcmask 1041408  }
  0x3e   :  { %v226_v40 = vsel %vm518_vm13, %v215_v33, %v216_v34  ;;  %v230_v41 = vsel %vm519_vm15, %v217_v35, %v218_v36 }
  0x3f   :  { %v227_v42 = vsel %vm520_vm2, %v223_v39, %v226_v40  ;;  %v233_v43 = vsel %vm113_vm1, %v219_v37, %v220_v38 }
  0x40   :  { %v234_v44 = vsel %vm117_vm5, %v230_v41, %v233_v43 }
  0x41   :  { %v235_v45 = vsel %vm119_vm9, %v227_v42, %v234_v44 }
  0x42   :  { %v238_v46 = vsel %vm152_vm7, %v235_v45, %v237_v2 }
  0x43   :  { %239 = vst [vmem:[%s493_s6] sm:$0xff] %v238_v46 }

</bundles_post_ra>
